<compile_context>
chip_gen: v6e
topology: v6e:2x2x1
jax: 0.10.0
libtpu: 0.0.40
codegen_flags: <defaults>
</compile_context>

<pallas_src>
import jax
import jax.numpy as jnp
from jax.experimental import pallas as pl
from jax.experimental.pallas import tpu as pltpu


NEG_SLOPE = 0.01  # torch.nn.functional.leaky_relu default


def _leaky_relu(x):
    return jnp.where(x > 0, x, NEG_SLOPE * x)


def _round_up(a, b):
    return (a + b - 1) // b * b


def logistic03_kernel(xt_ref, w1_ref, b1_ref, w2_ref, b2_ref, w3_ref, b3_ref,
                      o_ref):
    """Fused 3-layer MLP + sigmoid on one (F, TILE) column block of x^T.

    Torch semantics (x row-major):  h1 = leaky_relu(x @ W1^T + b1)
    Transposed form used here:      h1^T = leaky_relu(W1 @ x^T + b1[:, None])
    so the per-row scalar output lands as a lane-dense (1, TILE) row.
    """
    x = xt_ref[...].astype(jnp.float32)                                # (F, T)
    h = jnp.dot(w1_ref[...], x, preferred_element_type=jnp.float32)    # MXU
    h = _leaky_relu(h + b1_ref[...])                                   # (F, T)
    h = jnp.dot(w2_ref[...], h, preferred_element_type=jnp.float32)    # MXU
    h = _leaky_relu(h + b2_ref[...])
    # Final (F -> 1) layer: VPU multiply + sublane (XLU) reduce -> (1, T),
    # already lane-dense; SMEM scalar bias.
    z = jnp.sum(w3_ref[...] * h, axis=0, keepdims=True) + b3_ref[0]    # (1, T)
    # sigmoid(z) = 0.5 * (1 + tanh(z / 2)): one EUP push, exact in f32.
    o_ref[...] = 0.5 * (1.0 + jnp.tanh(0.5 * z))


def logistic03_forward(x_dict, edge_index_dict, edge_attr_dict, params, *,
                       tile_n=2048, stream_dtype=jnp.bfloat16):
    """Mirrors logistic_03.forward. edge_* dicts are unused (as in the module).

    `stream_dtype` controls only the HBM streaming dtype of x; all arithmetic
    is f32 (use jnp.float32 for bit-conservative parity with the reference).
    """
    del edge_index_dict, edge_attr_dict
    x_ind = x_dict["ind"]
    x_org = x_dict["org"]
    n, f = x_ind.shape

    w1, b1, w2, b2, w3, b3 = (params["w1"], params["b1"], params["w2"],
                              params["b2"], params["w3"], params["b3"])

    # Lane-dense streaming layout: x^T (F, N).  The transpose fuses with the
    # bf16 cast into a single XLA pass (and with the upstream producer when
    # this MLP is embedded in a larger graph).
    xt = x_ind.T.astype(stream_dtype)                                  # (F, N)

    # Row tile: as large as possible (per-step overhead ~0.35us dominates for
    # tiny per-row compute), but keep >= ~4 grid steps so v7x's two
    # TensorCores both get work via the "parallel" axis.  Multiples of 128 so
    # the lane-dense blocks stay aligned; tiny problems use a single block.
    if n <= 512:
        tile = n
    else:
        tile = min(tile_n, _round_up(pl.cdiv(n, 4), 128))
    num_tiles = pl.cdiv(n, tile)
    n_pad = num_tiles * tile

    resident = lambda shape: pl.BlockSpec(shape, lambda i: (0, 0))

    x_bytes = n * f * jnp.dtype(stream_dtype).itemsize
    w_bytes = (2 * f * f + 3 * f + 1) * 4
    cost = pl.CostEstimate(
        flops=int(4 * n * f * f + 8 * n * f),      # 2 FxF matmuls + tail layer
        transcendentals=int(n),                    # one tanh per row
        bytes_accessed=int(x_bytes + w_bytes + n_pad * 4),
    )

    out = pl.pallas_call(
        logistic03_kernel,
        out_shape=jax.ShapeDtypeStruct((1, n_pad), jnp.float32),
        grid=(num_tiles,),
        in_specs=[
            pl.BlockSpec((f, tile), lambda i: (0, i)),   # x^T: streamed columns
            resident((f, f)),                            # W1 (torch (out,in)), VMEM-resident
            resident((f, 1)),                            # b1 column
            resident((f, f)),                            # W2
            resident((f, 1)),                            # b2 column
            resident((f, 1)),                            # w3 column (== linear3.weight^T)
            pl.BlockSpec(memory_space=pltpu.MemorySpace.SMEM),  # b3 scalar
        ],
        out_specs=pl.BlockSpec((1, tile), lambda i: (0, i)),   # lane-dense row
        compiler_params=pltpu.CompilerParams(
            dimension_semantics=("parallel",)),
        cost_estimate=cost,
    )(xt, w1, b1, w2, b2, w3, b3)

    pred_ind = out[0, :n]        # (N_ind,)
    pred_org = x_org[:, 0]       # passthrough, (N_org,)
    return pred_ind, pred_org


def init_params(key, num_features_ind):
    """Deterministic init matching the PyTorch Linear shapes.

    Weights are kept in torch layout (out, in); biases and the final weight
    are stored as (F, 1) columns so the transposed kernel can broadcast them
    along lanes directly.  Init follows torch's default U(-1/sqrt(in), 1/sqrt(in)).
    """
    f = num_features_ind
    ks = jax.random.split(key, 6)
    bound = 1.0 / jnp.sqrt(jnp.float32(f))

    def u(k, shape):
        return jax.random.uniform(k, shape, jnp.float32, -bound, bound)

    return {
        "w1": u(ks[0], (f, f)),   # linear_ind_1.weight (out, in)
        "b1": u(ks[1], (f, 1)),
        "w2": u(ks[2], (f, f)),   # linear_ind_2.weight
        "b2": u(ks[3], (f, 1)),
        "w3": u(ks[4], (f, 1)),   # linear_ind_3.weight^T
        "b3": u(ks[5], (1,)),
    }


if __name__ == "__main__":
    key = jax.random.PRNGKey(0)
    k_ind, k_org, k_params, k_big = jax.random.split(key, 4)

    num_features_ind = 32
    num_features_org = 16
    n_ind = 8
    n_org = 8

    x_dict = {
        "ind": jax.random.normal(k_ind, (n_ind, num_features_ind), jnp.float32),
        "org": jax.random.normal(k_org, (n_org, num_features_org), jnp.float32),
    }
    edge_index_dict = {}   # unused by the module's forward
    edge_attr_dict = {}    # unused by the module's forward

    params = init_params(k_params, num_features_ind)

    # Pure-JAX reference in torch semantics (HIGHEST precision f32 matmuls).
    def ref(x):
        hp = jax.lax.Precision.HIGHEST
        h = _leaky_relu(jnp.dot(x, params["w1"].T, precision=hp)
                        + params["b1"][:, 0])
        h = _leaky_relu(jnp.dot(h, params["w2"].T, precision=hp)
                        + params["b2"][:, 0])
        z = jnp.dot(h, params["w3"][:, 0], precision=hp) + params["b3"][0]
        return jax.nn.sigmoid(z)

    # Reference seeing the same bf16-rounded x the streaming kernel sees.
    def ref_rounded(x):
        return ref(x.astype(jnp.bfloat16).astype(jnp.float32))

    pred_ind, pred_org = logistic03_forward(
        x_dict, edge_index_dict, edge_attr_dict, params)
    jax.block_until_ready((pred_ind, pred_org))

    assert pred_ind.shape == (n_ind,)
    assert pred_org.shape == (n_org,)
    assert jnp.allclose(pred_ind, ref_rounded(x_dict["ind"]), atol=5e-3)
    assert jnp.allclose(pred_ind, ref(x_dict["ind"]), atol=2e-2)
    assert jnp.allclose(pred_org, x_dict["org"][:, 0])

    # Multi-tile grid with a ragged tail (tile=256, grid=4 -> exercises the
    # pipelined streaming path, padded last block and lane-dense writeback).
    n_big = 1000
    x_big = jax.random.normal(k_big, (n_big, num_features_ind), jnp.float32)
    big_dict = {"ind": x_big, "org": x_dict["org"]}
    pred_big, _ = logistic03_forward(
        big_dict, edge_index_dict, edge_attr_dict, params)
    jax.block_until_ready(pred_big)
    assert pred_big.shape == (n_big,)
    assert jnp.allclose(pred_big, ref_rounded(x_big), atol=5e-3)
    assert jnp.allclose(pred_big, ref(x_big), atol=2e-2)

    # Bit-conservative f32 streaming path (no bf16 quantization of x).
    pred_f32, _ = logistic03_forward(
        big_dict, edge_index_dict, edge_attr_dict, params,
        stream_dtype=jnp.float32)
    jax.block_until_ready(pred_f32)
    assert jnp.allclose(pred_f32, ref(x_big), atol=5e-3)

    print("KERNEL_OK")
</pallas_src>

<mosaic_0001>
module attributes {stable_mosaic.version = 11 : i64} {
  func.func @logistic03_kernel(%arg0: i32, %arg1: memref<32x8xbf16, #tpu.memory_space<vmem>>, %arg2: memref<32x32xf32, #tpu.memory_space<vmem>>, %arg3: memref<32x1xf32, #tpu.memory_space<vmem>>, %arg4: memref<32x32xf32, #tpu.memory_space<vmem>>, %arg5: memref<32x1xf32, #tpu.memory_space<vmem>>, %arg6: memref<32x1xf32, #tpu.memory_space<vmem>>, %arg7: memref<1xf32, #tpu.memory_space<smem>>, %arg8: memref<1x8xf32, #tpu.memory_space<vmem>>) attributes {dimension_semantics = [#tpu.dimension_semantics<parallel>], iteration_bounds = array<i64: 1>, scalar_prefetch = 0 : i64, scratch_operands = 0 : i64, tpu.core_type = #tpu.core_type<tc>, window_params = [{transform_indices = @transform_0, window_bounds = array<i64: 32, 8>}, {pipeline_mode = #tpu.pipeline_mode<synchronous>, transform_indices = @transform_1, window_bounds = array<i64: 32, 32>}, {pipeline_mode = #tpu.pipeline_mode<synchronous>, transform_indices = @transform_2, window_bounds = array<i64: 32, 1>}, {pipeline_mode = #tpu.pipeline_mode<synchronous>, transform_indices = @transform_3, window_bounds = array<i64: 32, 32>}, {pipeline_mode = #tpu.pipeline_mode<synchronous>, transform_indices = @transform_4, window_bounds = array<i64: 32, 1>}, {pipeline_mode = #tpu.pipeline_mode<synchronous>, transform_indices = @transform_5, window_bounds = array<i64: 32, 1>}, {transform_indices = @transform_6, window_bounds = array<i64: 1>}, {transform_indices = @transform_7, window_bounds = array<i64: 1, 8>}]} {
    %c0 = arith.constant 0 : index
    %c0_0 = arith.constant 0 : index
    %0 = vector.load %arg1[%c0, %c0_0] : memref<32x8xbf16, #tpu.memory_space<vmem>>, vector<32x8xbf16>
    %1 = arith.extf %0 : vector<32x8xbf16> to vector<32x8xf32>
    %c0_1 = arith.constant 0 : index
    %c0_2 = arith.constant 0 : index
    %2 = vector.load %arg2[%c0_1, %c0_2] : memref<32x32xf32, #tpu.memory_space<vmem>>, vector<32x32xf32>
    %cst = arith.constant dense<0.000000e+00> : vector<32x8xf32>
    %3 = tpu.matmul %2, %1, %cst {dimension_numbers = #tpu.dot_dimension_numbers<[1], [0], [0], [1], [0, 0, 1, 1], [], []>} : vector<32x32xf32>, vector<32x8xf32>, vector<32x8xf32> -> vector<32x8xf32>
    %c0_3 = arith.constant 0 : index
    %c0_4 = arith.constant 0 : index
    %4 = vector.load %arg3[%c0_3, %c0_4] : memref<32x1xf32, #tpu.memory_space<vmem>>, vector<32x1xf32>
    %5 = vector.broadcast %4 : vector<32x1xf32> to vector<32x8xf32>
    %6 = arith.addf %3, %5 : vector<32x8xf32>
    %cst_5 = arith.constant 0.000000e+00 : f32
    %7 = vector.broadcast %cst_5 : f32 to vector<32x8xf32>
    %8 = arith.cmpf ogt, %6, %7 : vector<32x8xf32>
    %cst_6 = arith.constant 0.00999999977 : f32
    %9 = vector.broadcast %cst_6 : f32 to vector<32x8xf32>
    %10 = arith.mulf %9, %6 : vector<32x8xf32>
    %11 = arith.select %8, %6, %10 : vector<32x8xi1>, vector<32x8xf32>
    %c0_7 = arith.constant 0 : index
    %c0_8 = arith.constant 0 : index
    %12 = vector.load %arg4[%c0_7, %c0_8] : memref<32x32xf32, #tpu.memory_space<vmem>>, vector<32x32xf32>
    %cst_9 = arith.constant dense<0.000000e+00> : vector<32x8xf32>
    %13 = tpu.matmul %12, %11, %cst_9 {dimension_numbers = #tpu.dot_dimension_numbers<[1], [0], [0], [1], [0, 0, 1, 1], [], []>} : vector<32x32xf32>, vector<32x8xf32>, vector<32x8xf32> -> vector<32x8xf32>
    %c0_10 = arith.constant 0 : index
    %c0_11 = arith.constant 0 : index
    %14 = vector.load %arg5[%c0_10, %c0_11] : memref<32x1xf32, #tpu.memory_space<vmem>>, vector<32x1xf32>
    %15 = vector.broadcast %14 : vector<32x1xf32> to vector<32x8xf32>
    %16 = arith.addf %13, %15 : vector<32x8xf32>
    %cst_12 = arith.constant 0.000000e+00 : f32
    %17 = vector.broadcast %cst_12 : f32 to vector<32x8xf32>
    %18 = arith.cmpf ogt, %16, %17 : vector<32x8xf32>
    %cst_13 = arith.constant 0.00999999977 : f32
    %19 = vector.broadcast %cst_13 : f32 to vector<32x8xf32>
    %20 = arith.mulf %19, %16 : vector<32x8xf32>
    %21 = arith.select %18, %16, %20 : vector<32x8xi1>, vector<32x8xf32>
    %c0_14 = arith.constant 0 : index
    %c0_15 = arith.constant 0 : index
    %22 = vector.load %arg6[%c0_14, %c0_15] : memref<32x1xf32, #tpu.memory_space<vmem>>, vector<32x1xf32>
    %23 = vector.broadcast %22 : vector<32x1xf32> to vector<32x8xf32>
    %24 = arith.mulf %23, %21 : vector<32x8xf32>
    %cst_16 = arith.constant dense<0.000000e+00> : vector<8xf32>
    %25 = vector.multi_reduction <add>, %24, %cst_16 [0] : vector<32x8xf32> to vector<8xf32>
    %26 = vector.shape_cast %25 : vector<8xf32> to vector<1x8xf32>
    %c0_17 = arith.constant 0 : index
    %27 = memref.load %arg7[%c0_17] : memref<1xf32, #tpu.memory_space<smem>>
    %28 = vector.broadcast %27 : f32 to vector<1x8xf32>
    %29 = arith.addf %26, %28 : vector<1x8xf32>
    %cst_18 = arith.constant 5.000000e-01 : f32
    %30 = vector.broadcast %cst_18 : f32 to vector<1x8xf32>
    %31 = arith.mulf %30, %29 : vector<1x8xf32>
    %32 = math.tanh %31 : vector<1x8xf32>
    %cst_19 = arith.constant 1.000000e+00 : f32
    %33 = vector.broadcast %cst_19 : f32 to vector<1x8xf32>
    %34 = arith.addf %33, %32 : vector<1x8xf32>
    %cst_20 = arith.constant 5.000000e-01 : f32
    %35 = vector.broadcast %cst_20 : f32 to vector<1x8xf32>
    %36 = arith.mulf %35, %34 : vector<1x8xf32>
    %c0_21 = arith.constant 0 : index
    %c0_22 = arith.constant 0 : index
    %37 = vector.load %arg8[%c0_21, %c0_22] : memref<1x8xf32, #tpu.memory_space<vmem>>, vector<1x8xf32>
    tpu.vector_store %arg8[%c0_21, %c0_22], %36 {strides = array<i32>} : memref<1x8xf32, #tpu.memory_space<vmem>>, vector<1x8xf32>,
    return
  }
  func.func @transform_0(%arg0: i32) -> (i32, i32) {
    %c0_i32 = arith.constant 0 : i32
    %c0_i32_0 = arith.constant 0 : i32
    return %c0_i32, %arg0 : i32, i32
  }
  func.func @transform_1(%arg0: i32) -> (i32, i32) {
    %c0_i32 = arith.constant 0 : i32
    %c0_i32_0 = arith.constant 0 : i32
    %c0_i32_1 = arith.constant 0 : i32
    return %c0_i32, %c0_i32_0 : i32, i32
  }
  func.func @transform_2(%arg0: i32) -> (i32, i32) {
    %c0_i32 = arith.constant 0 : i32
    %c0_i32_0 = arith.constant 0 : i32
    %c0_i32_1 = arith.constant 0 : i32
    return %c0_i32, %c0_i32_0 : i32, i32
  }
  func.func @transform_3(%arg0: i32) -> (i32, i32) {
    %c0_i32 = arith.constant 0 : i32
    %c0_i32_0 = arith.constant 0 : i32
    %c0_i32_1 = arith.constant 0 : i32
    return %c0_i32, %c0_i32_0 : i32, i32
  }
  func.func @transform_4(%arg0: i32) -> (i32, i32) {
    %c0_i32 = arith.constant 0 : i32
    %c0_i32_0 = arith.constant 0 : i32
    %c0_i32_1 = arith.constant 0 : i32
    return %c0_i32, %c0_i32_0 : i32, i32
  }
  func.func @transform_5(%arg0: i32) -> (i32, i32) {
    %c0_i32 = arith.constant 0 : i32
    %c0_i32_0 = arith.constant 0 : i32
    %c0_i32_1 = arith.constant 0 : i32
    return %c0_i32, %c0_i32_0 : i32, i32
  }
  func.func @transform_6(%arg0: i32) -> i32 {
    %c0_i32 = arith.constant 0 : i32
    %c0_i32_0 = arith.constant 0 : i32
    return %c0_i32 : i32
  }
  func.func @transform_7(%arg0: i32) -> (i32, i32) {
    %c0_i32 = arith.constant 0 : i32
    %c0_i32_0 = arith.constant 0 : i32
    return %c0_i32, %arg0 : i32, i32
  }
}

</mosaic_0001>

<bundles_post_ra>
// kernel: tpu_custom_call.1
= control target key start
LH: loop header
LB: loop body
LE: loop exit
PB: predicated region body
PF: predicated region fallthrough
CT: control target
= control target key end

     0   :  { %vm64_vm0 = vcmask 261120   ;;  %v465_v5 = vmov 0   ;;  %s587_s0 = inlined_call_operand.vmem [shape: bf16[32,8], index: 0, kind: input, shape index: {}]   ;;  %s588_s1 = inlined_call_operand.vmem [shape: f32[32,32], index: 1, kind: input, shape index: {}]   ;;  %s589_s2 = inlined_call_operand.vmem [shape: f32[32,1], index: 2, kind: input, shape index: {}]   ;;  %s590_s3 = inlined_call_operand.vmem [shape: f32[32,32], index: 3, kind: input, shape index: {}]   ;;  %s591_s4 = inlined_call_operand.vmem [shape: f32[32,1], index: 4, kind: input, shape index: {}]   ;;  %s592_s5 = inlined_call_operand.vmem [shape: f32[32,1], index: 5, kind: input, shape index: {}]   ;;  %s593_s6 = inlined_call_operand.<no memory space> [shape: f32[1], index: 6, kind: input, shape index: {}]   ;;  %s594_s7 = inlined_call_operand.hbm [shape: f32[1,8], index: 7, kind: output, shape index: {}]  }
   0x1   :  { %v392_v0 = vld [vmem:[%s587_s0 + $0x8] sm:$0xff]   ;;  %v385_v1 = vld [vmem:[%s587_s0] sm:$0xff]   ;;  %439 = vset.pattern.permute.xlu0 %v465_v5  ;;  %v43_v6 = vld [vmem:[%s589_s2 + $0x18] sm:$0xff]  ;;  %440 = vset.pattern.permute.xlu1 %v465_v5 }
   0x2   :  { %v36_v2 = vld [vmem:[%s588_s1] sm:$0xff]  ;;  %v390_v3 = vunpack.c.l.bf16 %v392_v0  ;;  %v391_v4 = vunpack.c.h.bf16 %v392_v0  ;;  %v41_v7 = vld [vmem:[%s589_s2 + $0x8] sm:$0xff]  ;;  %v387_v8 = vunpack.c.h.bf16 %v385_v1  ;;  %61 = vperm.xlu0 %439, %v43_v6   ;;  %v42_v9 = vld [vmem:[%s589_s2 + $0x10] sm:$0xff]  ;;  %v386_v10 = vunpack.c.l.bf16 %v385_v1 }
   0x3   :  { %417 = vmatprep.mubr.msk.f32.mxu0 %vm64_vm0, %v36_v2  ;;  %51 = vperm.xlu1 %440, %v41_v7   ;;  %v40_v11 = vld [vmem:[%s589_s2] sm:$0xff] }
   0x4   :  { %409 = vmatprep.subr.mxu0 %v391_v4 }
   0x5   :  { %410 = vmatpush3.msra.mxu0 %v391_v4 }
   0x6   :  { %411 = vmatprep.subr.mxu0 %v390_v3 }
   0x7   :  { %412 = vmatpush3.msra.mxu0 %v390_v3 }
   0x8   :  { %13 = vsyncpa [#allocation4], 0  ;;  %413 = vmatprep.subr.mxu0 %v387_v8  ;;  %56 = vperm.xlu0 %439, %v42_v9   ;;  %v37_v12 = vld [vmem:[%s588_s1 + $0x8] sm:$0xff]  ;;  %v178_v13 = vld [vmem:[%s591_s4] sm:$0xff]  ;;  %vm339_vm8 = vcmask 64512   ;;  %s466_s17 = smov [#allocation3]  }
   0x9   :  { %414 = vmatpush3.msra.mxu0 %v387_v8  ;;  %46 = vperm.xlu1 %440, %v40_v11   ;;  %v38_v14 = vld [vmem:[%s588_s1 + $0x10] sm:$0xff]  ;;  %v179_v15 = vld [vmem:[%s591_s4 + $0x8] sm:$0xff]  ;;  %v39_v16 = vld [vmem:[%s588_s1 + $0x18] sm:$0xff]  ;;  %s368_s18 = sshll.u32 %s466_s17, 4  ;;  %vm360_vm10 = vcmask 57344   ;;  %s369_s18 = int_to_ptr.vmem [resolvable:$true] %s368_s18 }
   0xa   :  { %415 = vmatprep.subr.mxu0 %v386_v10  ;;  %v180_v17 = vld [vmem:[%s591_s4 + $0x10] sm:$0xff]  ;;  %v181_v18 = vld [vmem:[%s591_s4 + $0x18] sm:$0xff]  ;;  %v311_v19 = vld [vmem:[%s592_s5] sm:$0xff]  ;;  %s443_s19 = scalar_lea.vmem %s369_s18, 16  ;;  %s447_s2 = scalar_lea.vmem %s369_s18, 32 }
   0xb   :  { %416 = vmatpush3.msra.mxu0 %v386_v10  ;;  %v312_v20 = vld [vmem:[%s592_s5 + $0x8] sm:$0xff]  ;;  %v313_v21 = vld [vmem:[%s592_s5 + $0x10] sm:$0xff]  ;;  %v314_v22 = vld [vmem:[%s592_s5 + $0x18] sm:$0xff]  ;;  %p444_p0 = scmp.ne.s32.totalorder %s369_s18, %s443_s19  ;;  %p448_p1 = scmp.lt.s32.totalorder %s369_s18, %s369_s18 }
   0xc   :  { %418 = vmatmul.mubr.msk.f32.vlgmr.msra.gmra.mxu0 %vm64_vm0, %v37_v12  ;;  %184 = vperm.xlu0 %439, %v178_v13   ;;  %v174_v23 = vld [vmem:[%s590_s3] sm:$0xff]  ;;  %v175_v44 = vld [vmem:[%s590_s3 + $0x8] sm:$0xff]  ;;  %v176_v45 = vld [vmem:[%s590_s3 + $0x10] sm:$0xff]  ;;  %p449_p2 = scmp.lt.s32.totalorder %s447_s2, %s443_s19 }
   0xd   :  { %420 = vmatprep.mubr.msk.f32.mxu0 %vm64_vm0, %v38_v14  ;;  %189 = vperm.xlu1 %440, %v179_v15   ;;  %v177_v46 = vld [vmem:[%s590_s3 + $0x18] sm:$0xff] }
   0xe   :  { %431 = vmatprep.mubr.msk.f32.mxu1 %vm64_vm0, %v174_v23  ;;  %v354_v23 = vstv %s593_s6  ;;  %p450_p3 = por %p449_p2, %p448_p1 }
  0x10   :  { %421 = vmatmul.mubr.msk.f32.gmra.mxu0 %vm64_vm0, %v39_v16  ;;  %194 = vperm.xlu0 %439, %v180_v17   ;;  %p451_p4 = pnand %p450_p3, %p444_p0 }
  0x11   :  { %199 = vperm.xlu1 %440, %v181_v18  }
  0x14   :  { %317 = vperm.xlu0 %439, %v311_v19  }
  0x15   :  { %322 = vperm.xlu1 %440, %v312_v20  }
  0x18   :  { %327 = vperm.xlu0 %439, %v313_v21  }
  0x19   :  { %332 = vperm.xlu1 %440, %v314_v22  }
  0x7d   :  { %v62_v24 = vpop.permute.xlu0 %61 }
  0x7e   :  { %v52_v25 = vpop.permute.xlu1 %51 }
  0x83   :  { %v57_v29 = vpop.permute.xlu0 %56 }
  0x84   :  { %v47_v32 = vpop.permute.xlu1 %46 }
  0x87   :  { %v185_v47 = vpop.permute.xlu0 %184 }
  0x88   :  { %v190_v48 = vpop.permute.xlu1 %189 }
  0x8b   :  { %v195_v49 = vpop.permute.xlu0 %194 }
  0x8c   :  { %v200_v50 = vpop.permute.xlu1 %199 }
  0x8f   :  { %v318_v57 = vpop.permute.xlu0 %317 }
  0x90   :  { %v323_v58 = vpop.permute.xlu1 %322 }
  0x93   :  { %v328_v7 = vpop.permute.xlu0 %327 }
  0x94   :  { %v333_v8 = vpop.permute.xlu1 %332 }
  0xcc   :  { %v419_v26 = vpop.f32.mrf.mxu0 }
  0xcd   :  { %v149_v30 = vadd.f32 %v419_v26, %v52_v25 }
  0xce   :  { %v143_v27 = vpop.f32.mrf.mxu0 }
  0xcf   :  { %v144_v34 = vadd.f32 %v143_v27, %v47_v32  ;;  %v167_v37 = vmul.f32 0.01, %v149_v30  ;;  %vm163_vm3 = vcmp.gt.f32.partialorder %v149_v30, 0.0 }
  0xd0   :  { %v422_v28 = vpop.f32.mrf.mxu0 }
  0xd1   :  { %v159_v31 = vadd.f32 %v422_v28, %v62_v24  ;;  %v166_v40 = vmul.f32 0.01, %v144_v34  ;;  %vm162_vm4 = vcmp.gt.f32.partialorder %v144_v34, 0.0  ;;  %v171_v42 = vsel %vm163_vm3, %v149_v30, %v167_v37 }
  0xd2   :  { %v153_v33 = vpop.f32.mrf.mxu0 }
  0xd3   :  { %v154_v35 = vadd.f32 %v153_v33, %v57_v29  ;;  %vm165_vm1 = vcmp.gt.f32.partialorder %v159_v31, 0.0  ;;  %v169_v36 = vmul.f32 0.01, %v159_v31  ;;  %v170_v43 = vsel %vm162_vm4, %v144_v34, %v166_v40 }
  0xd5   :  { %v168_v38 = vmul.f32 0.01, %v154_v35  ;;  %v173_v39 = vsel %vm165_vm1, %v159_v31, %v169_v36  ;;  %vm164_vm2 = vcmp.gt.f32.partialorder %v154_v35, 0.0 }
  0xd6   :  { %423 = vmatprep.subr.mxu1 %v173_v39 }
  0xd7   :  { %424 = vmatpush3.msra.mxu1 %v173_v39  ;;  %v172_v41 = vsel %vm164_vm2, %v154_v35, %v168_v38 }
  0xd8   :  { %425 = vmatprep.subr.mxu1 %v172_v41 }
  0xd9   :  { %426 = vmatpush3.msra.mxu1 %v172_v41 }
  0xda   :  { %427 = vmatprep.subr.mxu1 %v171_v42 }
  0xdb   :  { %428 = vmatpush3.msra.mxu1 %v171_v42 }
  0xdc   :  { %429 = vmatprep.subr.mxu1 %v170_v43 }
  0xdd   :  { %430 = vmatpush3.msra.mxu1 %v170_v43 }
  0xde   :  { %432 = vmatmul.mubr.msk.f32.vlgmr.msra.gmra.mxu1 %vm64_vm0, %v175_v44 }
  0xdf   :  { %434 = vmatprep.mubr.msk.f32.mxu1 %vm64_vm0, %v176_v45 }
  0xe2   :  { %435 = vmatmul.mubr.msk.f32.gmra.mxu1 %vm64_vm0, %v177_v46 }
 0x19e   :  { %v433_v51 = vpop.f32.mrf.mxu1 }
 0x19f   :  { %v286_v52 = vadd.f32 %v433_v51, %v190_v48 }
 0x1a0   :  { %v280_v53 = vpop.f32.mrf.mxu1 }
 0x1a1   :  { %vm300_vm5 = vcmp.gt.f32.partialorder %v286_v52, 0.0  ;;  %v304_v54 = vmul.f32 0.01, %v286_v52  ;;  %v281_v55 = vadd.f32 %v280_v53, %v185_v47 }
 0x1a2   :  { %v436_v56 = vpop.f32.mrf.mxu1 }
 0x1a3   :  { %v308_v59 = vsel %vm300_vm5, %v286_v52, %v304_v54  ;;  %vm299_vm6 = vcmp.gt.f32.partialorder %v281_v55, 0.0  ;;  %v303_v60 = vmul.f32 0.01, %v281_v55  ;;  %v296_v61 = vadd.f32 %v436_v56, %v200_v50 }
 0x1a4   :  { %v290_v62 = vpop.f32.mrf.mxu1  ;;  %v336_v2 = vmul.f32 %v323_v58, %v308_v59 }
 0x1a5   :  { %v307_v63 = vsel %vm299_vm6, %v281_v55, %v303_v60  ;;  %vm302_vm7 = vcmp.gt.f32.partialorder %v296_v61, 0.0  ;;  %v306_v0 = vmul.f32 0.01, %v296_v61  ;;  %v291_v1 = vadd.f32 %v290_v62, %v195_v49 }
 0x1a6   :  { %v335_v3 = vmul.f32 %v318_v57, %v307_v63  ;;  %v341_v10 = vsel %vm339_vm8, %v336_v2, 0.0 }
 0x1a7   :  { %v310_v4 = vsel %vm302_vm7, %v296_v61, %v306_v0  ;;  %vm301_vm9 = vcmp.gt.f32.partialorder %v291_v1, 0.0  ;;  %v305_v5 = vmul.f32 0.01, %v291_v1 }
 0x1a8   :  { %v340_v6 = vsel %vm339_vm8, %v335_v3, 0.0  ;;  %v338_v11 = vmul.f32 %v333_v8, %v310_v4 }
 0x1a9   :  { %v309_v9 = vsel %vm301_vm9, %v291_v1, %v305_v5  ;;  %v342_v13 = vadd.f32 %v341_v10, %v340_v6 }
 0x1aa   :  { %v337_v12 = vmul.f32 %v328_v7, %v309_v9  ;;  %v345_v16 = vsel %vm339_vm8, %v338_v11, 0.0 }
 0x1ac   :  { %v343_v14 = vsel %vm339_vm8, %v337_v12, 0.0 }
 0x1ad   :  { %v344_v15 = vadd.f32 %v343_v14, %v342_v13 }
 0x1af   :  { %v346_v17 = vadd.f32 %v345_v16, %v344_v15 }
 0x1b1   :  { %v347_v18 = vrot.slane %v346_v17, 4 }
 0x1b3   :  { %v348_v19 = vadd.f32 %v347_v18, %v346_v17 }
 0x1b5   :  { %v349_v20 = vrot.slane %v348_v19, 2 }
 0x1b7   :  { %v350_v21 = vadd.f32 %v349_v20, %v348_v19 }
 0x1b9   :  { %v351_v22 = vrot.slane %v350_v21, 1 }
 0x1bb   :  { %v352_v24 = vadd.f32 %v351_v22, %v350_v21 }
 0x1bd   :  { %v355_v25 = vadd.f32 %v354_v23, %v352_v24 }
 0x1bf   :  { %v356_v26 = vmul.f32 0.5, %v355_v25 }
 0x1c1   :  { %441 = vtanh.f32 %v356_v26 }
 0x1ce   :  { %v442_v27 = vpop.eup %441 }
 0x1cf   :  { %v358_v28 = vadd.f32 1.0, %v442_v27 }
 0x1d1   :  { %v359_v29 = vmul.f32 0.5, %v358_v28 }
 0x1d3   :  { %361 = vst.msk [vmem:[#allocation3] sm:$0x1] %vm360_vm10, %v359_v29 }
 0x1d4   :  { %454 = shalt.err (!%p451_p4)
}
 0x1d5   :  { %371 = dma.vmem_to_hbm [thread:$0]  %s369_s18, 16, %s594_s7, [#allocation4]  }
 0x1d6   :  { %463 = dma.done.wait [#allocation4], 16  }
 0x1d7   :  { %464 = vsyncadd [#allocation4], 4294967280 }
 0x1d8   :  { %375 = vsyncpa [#allocation4], 1 }

</bundles_post_ra>
